<compile_context>
chip_gen: v6e
topology: v6e:2x2x1
jax: 0.10.0
libtpu: 0.0.40
codegen_flags: <defaults>
</compile_context>

<pallas_src>
import functools

import jax
import jax.numpy as jnp
from jax.experimental import pallas as pl
from jax.experimental.pallas import tpu as pltpu

_H1, _H2 = 256, 128   # hidden sizes fixed by the module
_LANE = 128           # TPU lane width
_TM_MAX = 2048        # max rows per grid step (fits v5e's 16 MiB scoped VMEM)


def _round_up(n, m):
    return ((n + m - 1) // m) * m


def _mlp_kernel(x_ref, w1_ref, b1_ref, w2_ref, b2_ref, w3_ref, b3_ref, o_ref):
    # Cast x to bf16 in-kernel (VPU, hidden under the MXU-bound schedule).
    xb = x_ref[...].astype(jnp.bfloat16)
    # layer1 + ReLU  (bf16 operands, f32 MXU accumulation)
    h1 = jnp.dot(xb, w1_ref[...], preferred_element_type=jnp.float32)
    h1 = jnp.maximum(h1 + b1_ref[...], 0.0).astype(jnp.bfloat16)
    # layer2 + ReLU
    h2 = jnp.dot(h1, w2_ref[...], preferred_element_type=jnp.float32)
    h2 = jnp.maximum(h2 + b2_ref[...], 0.0).astype(jnp.bfloat16)
    # layer3 + ReLU  (w3 is lane-padded to 128 for the MXU; store only the
    # real output columns -- masked store sits in the idle store slot)
    h3 = jnp.dot(h2, w3_ref[...], preferred_element_type=jnp.float32)
    out_size = o_ref.shape[1]
    o_ref[...] = jnp.maximum(h3[:, :out_size] + b3_ref[...], 0.0).astype(o_ref.dtype)


def prepare_params(params):
    """One-time prep: bf16 weights, w3 lane-padded to 128; f32 biases.

    Done outside the per-call jit path so the casts/pads are not re-emitted
    on every forward call.
    """
    w1, b1, w2, b2, w3, b3 = params
    out_size = w3.shape[1]
    out_pad = _round_up(out_size, _LANE)
    w3p = jnp.pad(w3, ((0, 0), (0, out_pad - out_size))).astype(jnp.bfloat16)
    return (w1.astype(jnp.bfloat16), b1,
            w2.astype(jnp.bfloat16), b2,
            w3p, b3)


@functools.partial(jax.jit, static_argnames=("tm_max",))
def mlp_forward(x, prepared_params, *, tm_max=_TM_MAX):
    """x: [batch, seq, input_size] f32 -> [batch, seq, output_size] f32."""
    w1, b1, w2, b2, w3p, b3 = prepared_params
    B, S, D = x.shape
    out_size = b3.shape[1]
    out_pad = w3p.shape[1]

    # Balanced grid: as few steps as possible under tm_max, but >= 2 steps so
    # v7x can shard the M loop across both TensorCores; no near-2x row-pad
    # cliff at M = tm_max + 1.
    M = B * S
    num_tiles = pl.cdiv(M, tm_max)
    if num_tiles < 2 and M > 8:
        num_tiles = 2
    TM = _round_up(pl.cdiv(M, num_tiles), 8)   # multiple of 8 (sublane)
    M_pad = TM * num_tiles

    x2d = x.reshape(M, D)                       # stays f32; cast in-kernel
    if M_pad != M:
        x2d = jnp.pad(x2d, ((0, M_pad - M), (0, 0)))

    grid = (num_tiles,)

    flops = 2 * M_pad * (D * _H1 + _H1 * _H2 + _H2 * out_pad)
    bytes_accessed = (
        x2d.size * 4                               # f32 input
        + w1.size * 2 + w2.size * 2 + w3p.size * 2  # bf16 weights
        + b1.size * 4 + b2.size * 4 + b3.size * 4   # f32 biases
        + M_pad * out_size * 4                      # f32 unpadded output
    )

    out2d = pl.pallas_call(
        _mlp_kernel,
        out_shape=jax.ShapeDtypeStruct((M_pad, out_size), jnp.float32),
        grid=grid,
        in_specs=[
            pl.BlockSpec((TM, D), lambda i: (i, 0)),          # x tile (streamed)
            pl.BlockSpec((D, _H1), lambda i: (0, 0)),         # w1 (resident)
            pl.BlockSpec((1, _H1), lambda i: (0, 0)),         # b1
            pl.BlockSpec((_H1, _H2), lambda i: (0, 0)),       # w2
            pl.BlockSpec((1, _H2), lambda i: (0, 0)),         # b2
            pl.BlockSpec((_H2, out_pad), lambda i: (0, 0)),   # w3 (lane-padded)
            pl.BlockSpec((1, out_size), lambda i: (0, 0)),    # b3 (unpadded)
        ],
        out_specs=pl.BlockSpec((TM, out_size), lambda i: (i, 0)),
        compiler_params=pltpu.CompilerParams(
            dimension_semantics=("parallel",)),
        cost_estimate=pl.CostEstimate(
            flops=flops, transcendentals=0, bytes_accessed=bytes_accessed),
    )(x2d, w1, b1, w2, b2, w3p, b3)

    return out2d[:M].reshape(B, S, out_size)


def init_params(key, input_size, output_size):
    """Deterministic init mirroring nn.Linear shapes.

    PyTorch stores weight as [out, in]; we keep the transposed [in, out]
    layout for the kernel's x @ W convention.
    """
    dims = [(input_size, 256), (256, 128), (128, output_size)]
    params = []
    for fan_in, fan_out in dims:
        kw, kb, key = jax.random.split(key, 3)
        bound = 1.0 / jnp.sqrt(fan_in)
        w = jax.random.uniform(kw, (fan_in, fan_out), jnp.float32, -bound, bound)
        b = jax.random.uniform(kb, (1, fan_out), jnp.float32, -bound, bound)
        params.extend([w, b])
    return tuple(params)


def _ref_forward(x, params):
    """Plain-JAX f32 reference (same math as the PyTorch module)."""
    w1, b1, w2, b2, w3, b3 = params
    h = jnp.maximum(x @ w1 + b1[0], 0.0)
    h = jnp.maximum(h @ w2 + b2[0], 0.0)
    return jnp.maximum(h @ w3 + b3[0], 0.0)


if __name__ == "__main__":
    key = jax.random.PRNGKey(0)
    kx, kp = jax.random.split(key)

    batch, seq, input_size, output_size = 2, 8, 32, 16
    x = jax.random.normal(kx, (batch, seq, input_size), jnp.float32)
    params = init_params(kp, input_size, output_size)
    prepared = prepare_params(params)

    out = mlp_forward(x, prepared)
    jax.block_until_ready(out)

    ref = _ref_forward(x, params)
    assert out.shape == (batch, seq, output_size)
    # bf16 matmuls with f32 accumulation vs. f32 reference -> loose tolerance.
    assert jnp.allclose(out, ref, atol=5e-2, rtol=5e-2)

    # Exercise the multi-tile grid path (no row padding needed).
    x2 = jax.random.normal(kx, (4, 300, input_size), jnp.float32)
    out2 = mlp_forward(x2, prepared)
    jax.block_until_ready(out2)
    ref2 = _ref_forward(x2, params)
    assert out2.shape == (4, 300, output_size)
    assert jnp.allclose(out2, ref2, atol=5e-2, rtol=5e-2)

    # Exercise the row-padding path (M = 903 -> 2 tiles of 456 rows).
    x3 = jax.random.normal(kx, (3, 301, input_size), jnp.float32)
    out3 = mlp_forward(x3, prepared)
    jax.block_until_ready(out3)
    ref3 = _ref_forward(x3, params)
    assert out3.shape == (3, 301, output_size)
    assert jnp.allclose(out3, ref3, atol=5e-2, rtol=5e-2)

    print("KERNEL_OK")
</pallas_src>

<mosaic_0001>
module attributes {stable_mosaic.version = 11 : i64} {
  func.func @_mlp_kernel(%arg0: i32, %arg1: memref<8x32xf32, #tpu.memory_space<vmem>>, %arg2: memref<32x256xbf16, #tpu.memory_space<vmem>>, %arg3: memref<1x256xf32, #tpu.memory_space<vmem>>, %arg4: memref<256x128xbf16, #tpu.memory_space<vmem>>, %arg5: memref<1x128xf32, #tpu.memory_space<vmem>>, %arg6: memref<128x128xbf16, #tpu.memory_space<vmem>>, %arg7: memref<1x16xf32, #tpu.memory_space<vmem>>, %arg8: memref<8x16xf32, #tpu.memory_space<vmem>>) attributes {dimension_semantics = [#tpu.dimension_semantics<parallel>], iteration_bounds = array<i64: 2>, scalar_prefetch = 0 : i64, scratch_operands = 0 : i64, tpu.core_type = #tpu.core_type<tc>, window_params = [{transform_indices = @transform_0, window_bounds = array<i64: 8, 32>}, {pipeline_mode = #tpu.pipeline_mode<synchronous>, transform_indices = @transform_1, window_bounds = array<i64: 32, 256>}, {pipeline_mode = #tpu.pipeline_mode<synchronous>, transform_indices = @transform_2, window_bounds = array<i64: 1, 256>}, {pipeline_mode = #tpu.pipeline_mode<synchronous>, transform_indices = @transform_3, window_bounds = array<i64: 256, 128>}, {pipeline_mode = #tpu.pipeline_mode<synchronous>, transform_indices = @transform_4, window_bounds = array<i64: 1, 128>}, {pipeline_mode = #tpu.pipeline_mode<synchronous>, transform_indices = @transform_5, window_bounds = array<i64: 128, 128>}, {pipeline_mode = #tpu.pipeline_mode<synchronous>, transform_indices = @transform_6, window_bounds = array<i64: 1, 16>}, {transform_indices = @transform_7, window_bounds = array<i64: 8, 16>}]} {
    %c0 = arith.constant 0 : index
    %c0_0 = arith.constant 0 : index
    %0 = vector.load %arg1[%c0, %c0_0] : memref<8x32xf32, #tpu.memory_space<vmem>>, vector<8x32xf32>
    %1 = arith.truncf %0 : vector<8x32xf32> to vector<8x32xbf16>
    %c0_1 = arith.constant 0 : index
    %c0_2 = arith.constant 0 : index
    %2 = vector.load %arg2[%c0_1, %c0_2] : memref<32x256xbf16, #tpu.memory_space<vmem>>, vector<32x256xbf16>
    %cst = arith.constant dense<0.000000e+00> : vector<8x256xf32>
    %3 = tpu.matmul %1, %2, %cst {dimension_numbers = #tpu.dot_dimension_numbers<[1], [0], [0], [1], [0, 0, 1, 1], [], []>} : vector<8x32xbf16>, vector<32x256xbf16>, vector<8x256xf32> -> vector<8x256xf32>
    %c0_3 = arith.constant 0 : index
    %c0_4 = arith.constant 0 : index
    %4 = vector.load %arg3[%c0_3, %c0_4] : memref<1x256xf32, #tpu.memory_space<vmem>>, vector<1x256xf32>
    %5 = vector.broadcast %4 : vector<1x256xf32> to vector<8x256xf32>
    %6 = arith.addf %3, %5 : vector<8x256xf32>
    %cst_5 = arith.constant 0.000000e+00 : f32
    %7 = vector.broadcast %cst_5 : f32 to vector<8x256xf32>
    %8 = arith.maximumf %6, %7 : vector<8x256xf32>
    %9 = arith.truncf %8 : vector<8x256xf32> to vector<8x256xbf16>
    %c0_6 = arith.constant 0 : index
    %c0_7 = arith.constant 0 : index
    %10 = vector.load %arg4[%c0_6, %c0_7] : memref<256x128xbf16, #tpu.memory_space<vmem>>, vector<256x128xbf16>
    %cst_8 = arith.constant dense<0.000000e+00> : vector<8x128xf32>
    %11 = tpu.matmul %9, %10, %cst_8 {dimension_numbers = #tpu.dot_dimension_numbers<[1], [0], [0], [1], [0, 0, 1, 1], [], []>} : vector<8x256xbf16>, vector<256x128xbf16>, vector<8x128xf32> -> vector<8x128xf32>
    %c0_9 = arith.constant 0 : index
    %c0_10 = arith.constant 0 : index
    %12 = vector.load %arg5[%c0_9, %c0_10] : memref<1x128xf32, #tpu.memory_space<vmem>>, vector<1x128xf32>
    %13 = vector.broadcast %12 : vector<1x128xf32> to vector<8x128xf32>
    %14 = arith.addf %11, %13 : vector<8x128xf32>
    %cst_11 = arith.constant 0.000000e+00 : f32
    %15 = vector.broadcast %cst_11 : f32 to vector<8x128xf32>
    %16 = arith.maximumf %14, %15 : vector<8x128xf32>
    %17 = arith.truncf %16 : vector<8x128xf32> to vector<8x128xbf16>
    %c0_12 = arith.constant 0 : index
    %c0_13 = arith.constant 0 : index
    %18 = vector.load %arg6[%c0_12, %c0_13] : memref<128x128xbf16, #tpu.memory_space<vmem>>, vector<128x128xbf16>
    %cst_14 = arith.constant dense<0.000000e+00> : vector<8x128xf32>
    %19 = tpu.matmul %17, %18, %cst_14 {dimension_numbers = #tpu.dot_dimension_numbers<[1], [0], [0], [1], [0, 0, 1, 1], [], []>} : vector<8x128xbf16>, vector<128x128xbf16>, vector<8x128xf32> -> vector<8x128xf32>
    %20 = vector.extract_strided_slice %19 {offsets = [0, 0], sizes = [8, 16], strides = [1, 1]} : vector<8x128xf32> to vector<8x16xf32>
    %c0_15 = arith.constant 0 : index
    %c0_16 = arith.constant 0 : index
    %21 = vector.load %arg7[%c0_15, %c0_16] : memref<1x16xf32, #tpu.memory_space<vmem>>, vector<1x16xf32>
    %22 = vector.broadcast %21 : vector<1x16xf32> to vector<8x16xf32>
    %23 = arith.addf %20, %22 : vector<8x16xf32>
    %cst_17 = arith.constant 0.000000e+00 : f32
    %24 = vector.broadcast %cst_17 : f32 to vector<8x16xf32>
    %25 = arith.maximumf %23, %24 : vector<8x16xf32>
    %c0_18 = arith.constant 0 : index
    %c0_19 = arith.constant 0 : index
    %26 = vector.load %arg8[%c0_18, %c0_19] : memref<8x16xf32, #tpu.memory_space<vmem>>, vector<8x16xf32>
    tpu.vector_store %arg8[%c0_18, %c0_19], %25 {strides = array<i32>} : memref<8x16xf32, #tpu.memory_space<vmem>>, vector<8x16xf32>,
    return
  }
  func.func @transform_0(%arg0: i32) -> (i32, i32) {
    %c0_i32 = arith.constant 0 : i32
    %c0_i32_0 = arith.constant 0 : i32
    return %arg0, %c0_i32 : i32, i32
  }
  func.func @transform_1(%arg0: i32) -> (i32, i32) {
    %c0_i32 = arith.constant 0 : i32
    %c0_i32_0 = arith.constant 0 : i32
    %c0_i32_1 = arith.constant 0 : i32
    return %c0_i32, %c0_i32_0 : i32, i32
  }
  func.func @transform_2(%arg0: i32) -> (i32, i32) {
    %c0_i32 = arith.constant 0 : i32
    %c0_i32_0 = arith.constant 0 : i32
    %c0_i32_1 = arith.constant 0 : i32
    return %c0_i32, %c0_i32_0 : i32, i32
  }
  func.func @transform_3(%arg0: i32) -> (i32, i32) {
    %c0_i32 = arith.constant 0 : i32
    %c0_i32_0 = arith.constant 0 : i32
    %c0_i32_1 = arith.constant 0 : i32
    return %c0_i32, %c0_i32_0 : i32, i32
  }
  func.func @transform_4(%arg0: i32) -> (i32, i32) {
    %c0_i32 = arith.constant 0 : i32
    %c0_i32_0 = arith.constant 0 : i32
    %c0_i32_1 = arith.constant 0 : i32
    return %c0_i32, %c0_i32_0 : i32, i32
  }
  func.func @transform_5(%arg0: i32) -> (i32, i32) {
    %c0_i32 = arith.constant 0 : i32
    %c0_i32_0 = arith.constant 0 : i32
    %c0_i32_1 = arith.constant 0 : i32
    return %c0_i32, %c0_i32_0 : i32, i32
  }
  func.func @transform_6(%arg0: i32) -> (i32, i32) {
    %c0_i32 = arith.constant 0 : i32
    %c0_i32_0 = arith.constant 0 : i32
    %c0_i32_1 = arith.constant 0 : i32
    return %c0_i32, %c0_i32_0 : i32, i32
  }
  func.func @transform_7(%arg0: i32) -> (i32, i32) {
    %c0_i32 = arith.constant 0 : i32
    %c0_i32_0 = arith.constant 0 : i32
    return %arg0, %c0_i32 : i32, i32
  }
}

</mosaic_0001>

<bundles_post_ra>
// kernel: mlp_forward.1
= control target key start
LH: loop header
LB: loop body
LE: loop exit
PB: predicated region body
PF: predicated region fallthrough
CT: control target
= control target key end

     0   :  { %s1479_s0 = inlined_call_operand.hbm [shape: f32[16,32], index: 0, kind: input, shape index: {}]   ;;  %s1480_s1 = inlined_call_operand.hbm [shape: bf16[32,256], index: 1, kind: input, shape index: {}]   ;;  %s1481_s2 = inlined_call_operand.vmem [shape: f32[1,256], index: 2, kind: input, shape index: {}]   ;;  %s1482_s3 = inlined_call_operand.hbm [shape: bf16[256,128], index: 3, kind: input, shape index: {}]   ;;  %s1483_s4 = inlined_call_operand.vmem [shape: f32[1,128], index: 4, kind: input, shape index: {}]   ;;  %s1484_s5 = inlined_call_operand.hbm [shape: bf16[128,128], index: 5, kind: input, shape index: {}]   ;;  %s1485_s6 = inlined_call_operand.vmem [shape: f32[1,16], index: 6, kind: input, shape index: {}]   ;;  %s1486_s7 = inlined_call_operand.hbm [shape: f32[16,16], index: 7, kind: output, shape index: {}]  }
   0x1   :  { %1491 = sst [smem:[#allocation15_spill]] %s1480_s1 }
   0x2   :  { %1492 = sst [smem:[#allocation16_spill]] %s1482_s3 }
   0x3   :  { %12 = vsyncpa [#allocation3], 0 }
   0x4   :  { %14 = vsyncpa [#allocation3 + $0x1], 0 }
   0x5   :  { %15 = vsyncpa [#allocation6], 0 }
   0x6   :  { %16 = vsyncpa [#allocation9], 0 }
   0x7   :  { %17 = vsyncpa [#allocation4], 0 }
   0x8   :  { %19 = vsyncpa [#allocation4 + $0x1], 0  ;;  %s1277_s24 = smov 0   ;;  %s1279_s25 = smov 0  }
   0x9   :  { %s1281_s26 = smov 0   ;;  %s1283_s27 = smov 0  }
   0xa LB: > { %s1298_s28 = sadd.s32 4294967295, %s1223_s27   ;;  %s831_s29 = sadd.s32 4294967294, %s1223_s27   ;;  %s1223_s27 = sphi %s1283_s27, %s1514_s27   ;;  %s1219_s26 = sphi %s1281_s26, %s1513_s26   ;;  %s1215_s25 = sphi %s1279_s25, %s1512_s25   ;;  %s1211_s24 = sphi %s1277_s24, %s1511_s24  }
   0xb   : > { %p45_p0 = scmp.ne.s32.totalorder %s1215_s25, %s1211_s24  ;;  %p1487_p1 = scmp.eq.s32.totalorder %s1298_s28, 0 }
   0xc   : > { %p201_p3 = scmp.eq.s32.totalorder %s831_s29, 1  ;;  %p832_p5 = scmp.ge.s32.totalorder %s1223_s27, 1 }
   0xd   : > { %p1307_p4 = por %p1487_p1, %p45_p0  ;;  %p208_p7 = scmp.lt.s32.totalorder %s1223_s27, 3 }
   0xe   : > { %p1312_p6 = por %p201_p3, %p45_p0  ;;  %s1225_s10 = smov [#allocation5]  }
   0xf   : > { %s1493_s30 = scalar_select %p1307_p4, 1, 0 }
  0x10   : > { %s1494_s8 = scalar_select %p1312_p6, 1, 0 }
  0x11   : > { %p1317_p8 = pnand %p832_p5, %p208_p7  ;;  %s220_s11 = sshll.u32 %s1225_s10, 4  ;;  %s221_s11 = int_to_ptr.vmem [resolvable:$true] %s220_s11 }
  0x12   : > { %s1226_s13 = smov [#allocation7]   ;;  %s1056_s15 = scalar_lea.vmem %s221_s11, 512 }
  0x13   : > { %s1495_s9 = scalar_select %p1317_p8, 1, 0 }
  0x14   : > { %p947_p9 = pneg %p1317_p8  ;;  %s236_s14 = sshll.u32 %s1226_s13, 4  ;;  %s237_s14 = int_to_ptr.vmem [resolvable:$true] %s236_s14 }
  0x15   : > { %p1057_p13 = scmp.ne.s32.totalorder %s221_s11, %s1056_s15  ;;  %p1064_p5 = scmp.lt.s32.totalorder %s221_s11, %s221_s11 }
  0x16   : > { %p1326_p11 = pnand %p947_p9, %p1487_p1  ;;  %p1065_p7 = scmp.lt.s32.totalorder %s1056_s15, %s1056_s15 }
  0x18   : > { %p1047_p12 = pneg %p1326_p11  ;;  %p1066_p10 = por %p1065_p7, %p1064_p5 }
  0x1a   : > { %p1059_p0 = pnand %p1057_p13, %p1047_p12 }
  0x1c   : > { %p1060_p3 = pneg %p1059_p0 }
  0x1e   : > { %p1067_p9 = pnand %p1066_p10, %p1060_p3 }
  0x20   : > { %1070 = shalt.err (!%p1067_p9)
}
  0x21   : > { %s1227_s16 = smov 128   ;;  %s1228_s17 = smov 8  }
  0x22   : > { %s1497_s1 = sld [smem:[#allocation15_spill]]  ;;  %s1082_s20 = scalar_lea.vmem %s237_s14, 2048 }
  0x23   : > { %p1083_p1 = scmp.ne.s32.totalorder %s237_s14, %s1082_s20  ;;  %p1090_p2 = scmp.lt.s32.totalorder %s237_s14, %s237_s14 }
  0x24   : > { %p1091_p6 = scmp.lt.s32.totalorder %s1082_s20, %s1082_s20 }
  0x25   : > { %p1085_p13 = pnand %p1083_p1, %p1047_p12 }
  0x26   : > { %p1092_p5 = por %p1091_p6, %p1090_p2 }
  0x27   : > { %p1086_p0 = pneg %p1085_p13 }
  0x28   : > { %950 = dma.hbm_to_vmem [thread:$0]  (!%p1326_p11), %s1497_s1, 512, %s221_s11, [#allocation6], %s1227_s16, %s1227_s16, %s1228_s17  }
  0x29   : > { %p1093_p10 = pnand %p1092_p5, %p1086_p0 }
  0x2b   : > { %1096 = shalt.err (!%p1093_p10)
}
  0x2c   : > { %s1229_s21 = smov 64   ;;  %s1230_s22 = smov 4  }
  0x2d   : > { %s1498_s3 = sld [smem:[#allocation16_spill]]  ;;  %s1231_s10 = smov [#allocation8]  }
  0x2e   : > { %s252_s11 = sshll.u32 %s1231_s10, 4  ;;  %s1349_s13 = sadd.s32 1, %s1223_s27   ;;  %s253_s11 = int_to_ptr.vmem [resolvable:$true] %s252_s11 }
  0x2f   : > { %s1108_s15 = scalar_lea.vmem %s253_s11, 1024  ;;  %p1116_p3 = scmp.lt.s32.totalorder %s253_s11, %s253_s11 }
  0x30   : > { %p1109_p1 = scmp.ne.s32.totalorder %s253_s11, %s1108_s15  ;;  %p1117_p7 = scmp.lt.s32.totalorder %s1108_s15, %s1108_s15 }
  0x32   : > { %p1111_p2 = pnand %p1109_p1, %p1047_p12  ;;  %p1118_p9 = por %p1117_p7, %p1116_p3 }
  0x33   : > { %953 = dma.hbm_to_vmem [thread:$0]  (!%p1326_p11), %s1498_s3, 2048, %s237_s14, [#allocation6], %s1229_s21, %s1229_s21, %s1230_s22  }
  0x34   : > { %p1112_p6 = pneg %p1111_p2 }
  0x36   : > { %p1119_p13 = pnand %p1118_p9, %p1112_p6 }
  0x38   : > { %1122 = shalt.err (!%p1119_p13)
}
  0x39   : > { %956 = dma.hbm_to_vmem [thread:$0]  (!%p1326_p11), %s1484_s5, 1024, %s253_s11, [#allocation9], %s1229_s21, %s1229_s21, %s1230_s22  }
  0x3a   : > { %s29_s17 = ssub.s32 %s1223_s27, %s1349_s13  ;;  %s32_s18 = sadd.s32 1, %s1219_s26 }
  0x3b   : > { %p30_p12 = scmp.eq.s32.totalorder %s29_s17, 0  ;;  %p39_p0 = scmp.ne.s32.totalorder %s1219_s26, %s1215_s25 }
  0x3c   : > { %p40_p5 = scmp.eq.s32.totalorder %s1223_s27, 0  ;;  %p968_p10 = scmp.lt.s32.totalorder %s1223_s27, 2 }
  0x3d   : > { %s1367_s12 = scalar_select %p30_p12, %s1219_s26, %s32_s18  }
  0x3e   : > { %p41_p1 = por %p40_p5, %p39_p0  ;;  %p1499_p2 = scmp.eq.s32.totalorder %s1298_s28, 1 }
  0x3f   : > { %s269_s20 = sand.u32 1, %s1219_s26   ;;  %s838_s23 = sshll.u32 %s1223_s27, 7 }
  0x40   : > { %p1371_p6 = por %p1499_p2, %p39_p0  ;;  %s837_s29 = sshll.u32 %s269_s20, 3 }
  0x41   : > { %s1380_s21 = scalar_lea.hbm %s1479_s0, %s838_s23  ;;  %s273_s22 = scalar_lea.vmem [#allocation2], %s837_s29 }
  0x42   : > { %s1500_s19 = scalar_select %p1371_p6, 1, 0 }
  0x43   : > { %s280_s11 = sshll.u32 %s273_s22, 4  ;;  %p1382_p11 = pnand %p968_p10, %p41_p1  ;;  %s281_s11 = int_to_ptr.vmem [resolvable:$true] %s280_s11 }
  0x44   : > { %s270_s14 = scalar_lea.sflag [#allocation3], %s269_s20  ;;  %s1123_s17 = scalar_lea.hbm %s1380_s21, 128 }
  0x45   : > { %p1124_p3 = scmp.ne.s32.totalorder %s1380_s21, %s1123_s17  ;;  %p1125_p7 = pneg %p1382_p11 }
  0x46   : > { %s1128_s10 = scalar_lea.hbm %s1479_s0, 256  ;;  %p1129_p12 = scmp.lt.s32.totalorder %s1380_s21, %s1479_s0 }
  0x47   : > { %p1126_p9 = pnand %p1125_p7, %p1124_p3  ;;  %p1130_p0 = scmp.lt.s32.totalorder %s1128_s10, %s1123_s17 }
  0x49   : > { %p1127_p13 = pneg %p1126_p9  ;;  %p1131_p5 = por %p1130_p0, %p1129_p12 }
  0x4b   : > { %p1132_p10 = pnand %p1131_p5, %p1127_p13 }
  0x4d   : > { %1135 = shalt.err (!%p1132_p10)
}
  0x4e   : > { %s1136_s22 = scalar_lea.vmem %s281_s11, 128  ;;  %s1232_s20 = smov [#allocation2]  }
  0x4f   : > { %p1137_p1 = scmp.ne.s32.totalorder %s281_s11, %s1136_s22  ;;  %s1141_s1 = sshll.u32 %s1232_s20, 4  ;;  %s1142_s1 = int_to_ptr.vmem [resolvable:$false] %s1141_s1 }
  0x50   : > { %s1143_s3 = scalar_lea.vmem %s1142_s1, 256  ;;  %p1144_p3 = scmp.lt.s32.totalorder %s281_s11, %s1142_s1 }
  0x51   : > { %p1139_p2 = pnand %p1137_p1, %p1125_p7  ;;  %p1145_p9 = scmp.lt.s32.totalorder %s1143_s3, %s1136_s22 }
  0x53   : > { %p1140_p6 = pneg %p1139_p2  ;;  %p1146_p4 = por %p1145_p9, %p1144_p3 }
  0x55   : > { %p1147_p8 = pnand %p1146_p4, %p1140_p6 }
  0x57   : > { %1150 = shalt.err (!%p1147_p8)
}
  0x58   : > { %960 = dma.hbm_to_vmem [thread:$0]  (!%p1382_p11), %s1380_s21, 128, %s281_s11, %s270_s14  }
  0x59   : > { %p1502_p13 = scmp.ne.s32.totalorder %s1495_s9, 0 }
  0x5a   : > { %s1403_s17 = sand.u32 (!%p1502_p13), 1, %s1215_s25   ;;  %p1503_p4 = scmp.ne.s32.totalorder (!%p1502_p13), %s1493_s30, 0 }
  0x5b   : > { %289 = sbr.rel (%p1502_p13) target bundleno = 729 (0x2d9), region = 48  ;;  %s840_s18 = sshll.u32 (!%p1502_p13), %s1403_s17, 3 }
  0x5c   : > { %s292_s1 = scalar_lea.sflag (!%p1502_p13), [#allocation3], %s1403_s17  ;;  %s295_s3 = scalar_lea.vmem (!%p1502_p13), [#allocation2], %s840_s18 }
  0x60   : > { %1194 = dma.done.wait (%p1503_p4), %s292_s1, 128  }
  0x61   : > { %1196 = vsyncadd (%p1503_p4), %s292_s1, 4294967168  ;;  %p1504_p8 = scmp.eq.s32.totalorder %s1298_s28, 0 }
  0x63   : > { %1198 = dma.done.wait (%p1504_p8), [#allocation6], 2560   ;;  %p1505_p6 = pmov %p1504_p8 }
  0x65   : > { %1200 = vsyncadd (%p1505_p6), [#allocation6], 4294964736  ;;  %p1506_p11 = pmov %p1505_p6 }
  0x66   : > { %p1507_p7 = pmov %p1505_p6 }
  0x67   : > { %1202 = dma.done.wait (%p1506_p11), [#allocation9], 1024  }
  0x68   : > { %1204 = vsyncadd (%p1507_p7), [#allocation9], 4294966272  ;;  %v1233_v0 = vmov 0   ;;  %v1015_v1 = vld [vmem:[#allocation5 + $0x14] ss:$8 sps:$4 sm:$0xff]   ;;  %vm377_vm0 = vcmask 261120   ;;  %v347_v29 = vlaneseq }
  0x69   : > { %413 = vmatprep.mubr.bf16.mxu0 %v1233_v0  ;;  %v1017_v2 = vld [vmem:[#allocation5 + $0x10] ss:$8 sps:$4 sm:$0xff]   ;;  %393 = vmatprep.subr.bf16.mxu0 %v1015_v1  ;;  %v1018_v3 = vld [vmem:[#allocation5 + $0x4] ss:$8 sps:$4 sm:$0xff]   ;;  %v1020_v4 = vld [vmem:[#allocation5] ss:$8 sps:$4 sm:$0xff]  }
  0x6a   : > { %v339_v5 = vld [vmem:[%s295_s3] sm:$0xff]  ;;  %394 = vmatpush1.bf16.msra.mxu0 %v1017_v2  ;;  %v1025_v11 = vld [vmem:[#allocation7 + $0x68] sm:$0xff]   ;;  %v1027_v13 = vld [vmem:[#allocation7 + $0x60] sm:$0xff]   ;;  %v1234_v24 = vmov 0.0   ;;  %v348_v30 = vshrl.u32 %v347_v29, 7  ;;  %vm1235_vm1 = vmmov 0  }
  0x6b   : > { %v1021_v6 = vld [vmem:[#allocation7 + $0x78] sm:$0xff]   ;;  %395 = vmatprep.subr.bf16.mxu0 %v1018_v3  ;;  %v1023_v8 = vld [vmem:[#allocation7 + $0x70] sm:$0xff]   ;;  %v340_v9 = vpack.c.bf16 %v339_v5, %v339_v5  ;;  %v1026_v12 = vld [vmem:[#allocation7 + $0x28] sm:$0xff]   ;;  %s877_s23 = sshll.u32 %s1298_s28, 7  ;;  %s337_s10 = scalar_lea.vmem [#allocation10], %s840_s18  ;;  %vm716_vm2 = vcmask 130048  }
  0x6c   : > { %v1022_v7 = vld [vmem:[#allocation7 + $0x38] sm:$0xff]   ;;  %880 = vmatprep.subr.bf16.mxu1 %v1021_v6  ;;  %v1024_v10 = vld [vmem:[#allocation7 + $0x30] sm:$0xff]   ;;  %v1028_v14 = vld [vmem:[#allocation7 + $0x20] sm:$0xff]   ;;  %v349_v31 = vsub.s32 0, %v348_v30  ;;  %v353_v33 = vsub.s32 1, %v348_v30  ;;  %s732_s15 = sshll.u32 %s337_s10, 4  ;;  %s1436_s20 = scalar_lea.hbm %s1486_s7, %s877_s23  ;;  %s1438_s15 = int_to_ptr.vmem [resolvable:$true] %s732_s15 }
  0x6d   : > { %881 = vmatpush3.bf16.msra.mxu1 %v1022_v7  ;;  %v1029_v15 = vld [vmem:[#allocation7 + $0x58] sm:$0xff]   ;;  %v1031_v17 = vld [vmem:[#allocation7 + $0x50] sm:$0xff]   ;;  %v1033_v19 = vld [vmem:[#allocation7 + $0x48] sm:$0xff]   ;;  %s719_s28 = scalar_lea.sflag [#allocation4], %s1403_s17  ;;  %s1151_s18 = scalar_lea.vmem %s1438_s15, 128 }
  0x6e   : > { %396 = vmatpush1.bf16.msra.mxu0 %v1020_v4  ;;  %882 = vmatprep.subr.bf16.mxu1 %v1023_v8  ;;  %v1030_v16 = vld [vmem:[#allocation7 + $0x18] sm:$0xff]   ;;  %v1032_v18 = vld [vmem:[#allocation7 + $0x10] sm:$0xff]   ;;  %v1034_v20 = vld [vmem:[#allocation7 + $0x8] sm:$0xff]   ;;  %p1152_p12 = scmp.ne.s32.totalorder %s1438_s15, %s1151_s18  ;;  %p1508_p0 = scmp.ne.s32.totalorder %s1500_s19, 0 }
  0x6f   : > { %v1035_v21 = vld [vmem:[#allocation7 + $0x40] sm:$0xff]   ;;  %v1037_v23 = vld [vmem:[#allocation8 + $0x38] sm:$0xff]   ;;  %911 = vmatprep.subr.bf16.mxu0 %v1234_v24  ;;  %v1038_v25 = vld [vmem:[#allocation8 + $0x30] sm:$0xff]   ;;  %s1236_s1 = smov [#allocation10]  }
  0x70   : > { %v1036_v22 = vld [vmem:[#allocation7] sm:$0xff]   ;;  %v1039_v26 = vld [vmem:[#allocation8 + $0x28] sm:$0xff]   ;;  %v1041_v28 = vld [vmem:[#allocation8 + $0x18] sm:$0xff]   ;;  %p1153_p5 = pnand %p1152_p12, %p1508_p0  ;;  %s1155_s3 = sshll.u32 %s1236_s1, 4  ;;  %s1156_s3 = int_to_ptr.vmem [resolvable:$false] %s1155_s3 }
  0x71   : > { %849 = vmatmul.mubr.msk.bf16.vlgmr.msra.gmra.mxu0 %vm377_vm0, %v340_v9  ;;  %883 = vmatpush3.bf16.msra.mxu1 %v1024_v10  ;;  %v1040_v27 = vld [vmem:[#allocation8 + $0x20] sm:$0xff]   ;;  %v345_v32 = vld [vmem:[%s1481_s2] sm:$0x3]  ;;  %v1043_v47 = vld [vmem:[#allocation8 + $0x8] sm:$0xff]   ;;  %s1157_s30 = scalar_lea.vmem %s1156_s3, 256  ;;  %p1158_p1 = scmp.lt.s32.totalorder %s1438_s15, %s1156_s3 }
  0x72   : > { %884 = vmatprep.subr.bf16.mxu1 %v1025_v11  ;;  %912 = vmatpush3.bf16.msra.mxu0 %v1037_v23  ;;  %v350_v34 = vrot.slane %v345_v32, %v349_v31  ;;  %v354_v35 = vrot.slane %v345_v32, %v353_v33  ;;  %v1042_v46 = vld [vmem:[#allocation8 + $0x10] sm:$0xff]   ;;  %v1044_v48 = vld [vmem:[#allocation8] sm:$0xff]   ;;  %p1154_p10 = pneg %p1153_p5  ;;  %p1159_p2 = scmp.lt.s32.totalorder %s1157_s30, %s1151_s18 }
  0x73   : > { %913 = vmatprep.subr.bf16.mxu0 %v1234_v24  ;;  %927 = vmatprep.mubr.msk.bf16.mxu0 %vm1235_vm1, %v1234_v24  ;;  %v850_v50 = vld [vmem:[%s1483_s4] ss:$0 sm:$0xff] }
  0x74   : > { %v875_v58 = vld [vmem:[%s1485_s6] ss:$0 sm:$0xff]  ;;  %p1160_p3 = por %p1159_p2, %p1158_p1 }
  0x75   : > { %885 = vmatpush3.bf16.msra.mxu1 %v1026_v12 }
  0x76   : > { %886 = vmatprep.subr.bf16.mxu1 %v1027_v13  ;;  %914 = vmatpush3.bf16.msra.mxu0 %v1038_v25  ;;  %p1161_p9 = pnand %p1160_p3, %p1154_p10 }
  0x77   : > { %915 = vmatprep.subr.bf16.mxu0 %v1234_v24 }
  0x79   : > { %887 = vmatpush3.bf16.msra.mxu1 %v1028_v14 }
  0x7a   : > { %888 = vmatprep.subr.bf16.mxu1 %v1029_v15  ;;  %916 = vmatpush3.bf16.msra.mxu0 %v1039_v26 }
  0x7b   : > { %917 = vmatprep.subr.bf16.mxu0 %v1234_v24 }
  0x7d   : > { %889 = vmatpush3.bf16.msra.mxu1 %v1030_v16 }
  0x7e   : > { %890 = vmatprep.subr.bf16.mxu1 %v1031_v17  ;;  %918 = vmatpush3.bf16.msra.mxu0 %v1040_v27 }
  0x7f   : > { %919 = vmatprep.subr.bf16.mxu0 %v1234_v24 }
  0x81   : > { %891 = vmatpush3.bf16.msra.mxu1 %v1032_v18 }
  0x82   : > { %892 = vmatprep.subr.bf16.mxu1 %v1033_v19  ;;  %920 = vmatpush3.bf16.msra.mxu0 %v1041_v28 }
  0x83   : > { %921 = vmatprep.subr.bf16.mxu0 %v1234_v24 }
  0x85   : > { %893 = vmatpush3.bf16.msra.mxu1 %v1034_v20 }
  0x86   : > { %894 = vmatprep.subr.bf16.mxu1 %v1035_v21  ;;  %922 = vmatpush3.bf16.msra.mxu0 %v1042_v46 }
  0x87   : > { %923 = vmatprep.subr.bf16.mxu0 %v1234_v24 }
  0x89   : > { %895 = vmatpush3.bf16.msra.mxu1 %v1036_v22 }
  0x8a   : > { %924 = vmatpush3.bf16.msra.mxu0 %v1043_v47 }
  0x8b   : > { %925 = vmatprep.subr.bf16.mxu0 %v1234_v24 }
  0x8e   : > { %926 = vmatpush3.bf16.msra.mxu0 %v1044_v48 }
 0x131   : > { %v415_v36 = vpop.f32.mrf.mxu0 }
 0x132   : > { %v416_v37 = vadd.f32 %v415_v36, %v350_v34 }
 0x133   : > { %v417_v38 = vpop.f32.mrf.mxu0 }
 0x134   : > { %v418_v39 = vadd.f32 %v417_v38, %v354_v35  ;;  %v422_v40 = vmax.f32 %v416_v37, 0.0 }
 0x135   : > { %v419_v41 = vpop.f32.mrf.mxu0 }
 0x136   : > { %v423_v42 = vmax.f32 %v418_v39, 0.0  ;;  %v424_v45 = vpack.c.bf16 %v422_v40, %v422_v40 }
 0x137   : > { %v420_v43 = vpop.f32.mrf.mxu0 }
 0x138   : > { %v425_v44 = vpack.c.bf16 %v423_v42, %v423_v42 }
 0x13a   : > { %593 = vmatprep.mubr.bf16.mxu1 %v425_v44 }
 0x13b   : > { %594 = vmatmul.mubr.bf16.vlgmr.msra.gmra.mxu1 %v424_v45 }
 0x1fb   : > { %v896_v49 = vpop.f32.mrf.mxu1 }
 0x1fd   : > { %v897_v51 = vpop.f32.mrf.mxu1 }
 0x1fe   : > { %v898_v52 = vadd.f32 %v897_v51, %v896_v49 }
 0x1ff   : > { %v899_v53 = vpop.f32.mrf.mxu1 }
 0x200   : > { %v596_v54 = vadd.f32 %v898_v52, %v850_v50 }
 0x201   : > { %v900_v55 = vpop.f32.mrf.mxu1 }
 0x202   : > { %v601_v56 = vmax.f32 %v596_v54, 0.0 }
 0x204   : > { %v602_v57 = vpack.c.bf16 %v601_v56, %v601_v56 }
 0x206   : > { %928 = vmatmul.mubr.bf16.vlgmr.msra.gmra.mxu0 %v602_v57 }
 0x2c6   : > { %v701_v59 = vpop.f32.mrf.mxu0 }
 0x2c7   : > { %v714_v60 = vadd.f32 %v875_v58, %v701_v59 }
 0x2c8   : > { %v929_v61 = vpop.f32.mrf.mxu0 }
 0x2c9   : > { %v715_v62 = vmax.f32 %v714_v60, 0.0 }
 0x2ca   : > { %v704_v63 = vpop.f32.mrf.mxu0 }
 0x2cb   : > { %717 = vst.msk [vmem:[%s337_s10] sm:$0xff] %vm716_vm2, %v715_v62 }
 0x2cc   : > { %v930_v0 = vpop.f32.mrf.mxu0 }
 0x2cd   : > { %1164 = shalt.err (!%p1161_p9)
}
 0x2ce   : > { %s1165_s9 = scalar_lea.hbm %s1436_s20, 128  ;;  %s1169_s11 = scalar_lea.hbm %s1486_s7, 256 }
 0x2cf   : > { %p1166_p13 = scmp.ne.s32.totalorder %s1436_s20, %s1165_s9  ;;  %p1170_p6 = scmp.lt.s32.totalorder %s1436_s20, %s1486_s7 }
 0x2d0   : > { %p1171_p11 = scmp.lt.s32.totalorder %s1169_s11, %s1165_s9 }
 0x2d1   : > { %p1167_p4 = pnand %p1166_p13, %p1508_p0 }
 0x2d2   : > { %p1172_p7 = por %p1171_p11, %p1170_p6 }
 0x2d3   : > { %p1168_p8 = pneg %p1167_p4 }
 0x2d5   : > { %p1173_p12 = pnand %p1172_p7, %p1168_p8 }
 0x2d7   : > { %1176 = shalt.err (!%p1173_p12)
}
 0x2d8   : > { %945 = dma.vmem_to_hbm [thread:$0]  (%p1508_p0), %s1438_s15, 128, %s1436_s20, %s719_s28  }
 0x2d9 PF: > { %s744_s23 = sand.u32 1, %s1211_s24   ;;  %p1509_p5 = scmp.ne.s32.totalorder %s1494_s8, 0 }
 0x2da   : > { %p1510_p10 = scmp.ge.s32.totalorder %s1223_s27, 2  ;;  %s745_s10 = scalar_lea.sflag [#allocation4], %s744_s23 }
 0x2dc   : > { %p962_p1 = pnand %p1510_p10, %p1509_p5 }
 0x2de   : > { %p963_p2 = pneg %p962_p1 }
 0x2e0   : > { %1206 = dma.done.wait (%p963_p2), %s745_s10, 128  }
 0x2e1   : > { %1208 = vsyncadd (%p963_p2), %s745_s10, 4294967168  ;;  %p22_p3 = scmp.ge.s32.totalorder %s1349_s13, 4   ;;  %s1511_s24 = smov %s1215_s25 }
 0x2e2   : > { %s1512_s25 = smov %s1219_s26  ;;  %s1513_s26 = smov %s1367_s12 }
 0x2e3   : > { %s1514_s27 = smov %s1349_s13  ;;  %24 = sbr.rel (!%p22_p3) target bundleno = 10 (0xa), region = 105 }
 0x2e8   :  { %750 = vsyncpa [#allocation3], 1 }
 0x2e9   :  { %752 = vsyncpa [#allocation3 + $0x1], 1 }
 0x2ea   :  { %753 = vsyncpa [#allocation6], 1 }
 0x2eb   :  { %754 = vsyncpa [#allocation9], 1 }
 0x2ec   :  { %755 = vsyncpa [#allocation4], 1 }
 0x2ed   :  { %757 = vsyncpa [#allocation4 + $0x1], 1 }

</bundles_post_ra>
